<compile_context>
chip_gen: v5e
topology: v5e:2x2
jax: 0.10.0
libtpu: 0.0.40
codegen_flags: <defaults>
</compile_context>

<pallas_src>
import math
import jax
import jax.numpy as jnp
from jax import lax
from jax.experimental import pallas as pl
from jax.experimental.pallas import tpu as pltpu


# ----------------------------------------------------------------------------- utils
def _round_up(n, m):
    return ((n + m - 1) // m) * m


def _tile(n, pref, align):
    """Return (tile, padded_total). `pref` must be a multiple of `align`."""
    n_al = _round_up(n, align)
    if n_al <= pref:
        return n_al, n_al
    return pref, _round_up(n, pref)


# ----------------------------------------------------------------------------- linear
def _linear_kernel(x_ref, w_ref, b_ref, o_ref, acc_ref):
    k = pl.program_id(2)

    @pl.when(k == 0)
    def _():
        acc_ref[...] = jnp.zeros_like(acc_ref)

    # bf16 operands (cast in wrapper), f32 accumulation on the MXU.
    acc_ref[...] += jnp.dot(x_ref[...], w_ref[...],
                            preferred_element_type=jnp.float32)

    @pl.when(k == pl.num_programs(2) - 1)
    def _():
        o_ref[...] = (acc_ref[...] + b_ref[...]).astype(o_ref.dtype)


def _linear(x2d, w, b, *, out_dtype=jnp.float32):
    """y = x2d @ w + b, tiled over (M, N, K) with a VMEM accumulator."""
    M, K = x2d.shape
    K2, N = w.shape
    assert K == K2

    tm, Mp = _tile(M, 256, 8)
    tn, Np = _tile(N, 256, 128)     # lane-dense output tiles
    tk, Kp = _tile(K, 512, 128)

    xb = jnp.pad(x2d.astype(jnp.bfloat16), ((0, Mp - M), (0, Kp - K)))
    wb = jnp.pad(w, ((0, Kp - K), (0, Np - N))).astype(jnp.bfloat16)
    bb = jnp.pad(b.reshape(1, N), ((0, 0), (0, Np - N))).astype(jnp.float32)

    out = pl.pallas_call(
        _linear_kernel,
        out_shape=jax.ShapeDtypeStruct((Mp, Np), out_dtype),
        grid_spec=pltpu.PrefetchScalarGridSpec(
            num_scalar_prefetch=0,
            grid=(Mp // tm, Np // tn, Kp // tk),
            in_specs=[
                pl.BlockSpec((tm, tk), lambda i, j, k: (i, k)),
                pl.BlockSpec((tk, tn), lambda i, j, k: (k, j)),
                pl.BlockSpec((1, tn), lambda i, j, k: (0, j)),
            ],
            out_specs=pl.BlockSpec((tm, tn), lambda i, j, k: (i, j)),
            scratch_shapes=[pltpu.VMEM((tm, tn), jnp.float32)],
        ),
        compiler_params=pltpu.CompilerParams(
            dimension_semantics=("parallel", "parallel", "arbitrary"),
            vmem_limit_bytes=64 * 1024 * 1024),
    )(xb, wb, bb)
    return out[:M, :N]


# ----------------------------------------------------------------------------- flash attention
def _make_flash_kernel(scale, t_actual, tq, tk):
    def kernel(q_ref, k_ref, v_ref, o_ref, m_ref, l_ref, acc_ref):
        qi = pl.program_id(1)
        ki = pl.program_id(2)

        @pl.when(ki == 0)
        def _():
            m_ref[...] = jnp.full_like(m_ref, -jnp.inf)
            l_ref[...] = jnp.zeros_like(l_ref)
            acc_ref[...] = jnp.zeros_like(acc_ref)

        # Skip kv tiles that lie entirely above the causal diagonal (tq == tk).
        @pl.when(ki <= qi)
        def _():
            q = q_ref[...]                      # (tq, hd_pad) bf16
            k = k_ref[...]                      # (tk, hd_pad) bf16
            v = v_ref[...]                      # (tk, hd_pad) bf16

            # Contract the head dim of both operands (no explicit transpose).
            s = lax.dot_general(q, k, (((1,), (1,)), ((), ())),
                                preferred_element_type=jnp.float32) * scale

            # Per-tile causal + sequence-padding mask.
            q_pos = qi * tq + lax.broadcasted_iota(jnp.int32, (tq, tk), 0)
            k_pos = ki * tk + lax.broadcasted_iota(jnp.int32, (tq, tk), 1)
            s = jnp.where((k_pos <= q_pos) & (k_pos < t_actual), s, -jnp.inf)

            # Online softmax (f32).
            m_prev = m_ref[...]
            m_new = jnp.maximum(m_prev, s.max(axis=-1, keepdims=True))
            alpha = jnp.exp(m_prev - m_new)
            p = jnp.exp(s - m_new)
            l_ref[...] = alpha * l_ref[...] + p.sum(axis=-1, keepdims=True)
            acc_ref[...] = alpha * acc_ref[...] + jnp.dot(
                p.astype(v.dtype), v, preferred_element_type=jnp.float32)
            m_ref[...] = m_new

        @pl.when(ki == pl.num_programs(2) - 1)
        def _():
            o_ref[...] = (acc_ref[...] *
                          pl.reciprocal(l_ref[...], approx=True)).astype(o_ref.dtype)

    return kernel


def _flash_attention(q, k, v, *, scale, t_actual, tq):
    """q, k, v: (BH, T_pad, hd_pad) bf16 -> (BH, T_pad, hd_pad) bf16."""
    BH, T_pad, hd_pad = q.shape
    tk = tq
    kernel = _make_flash_kernel(scale, t_actual, tq, tk)

    return pl.pallas_call(
        kernel,
        out_shape=jax.ShapeDtypeStruct((BH, T_pad, hd_pad), jnp.bfloat16),
        grid_spec=pltpu.PrefetchScalarGridSpec(
            num_scalar_prefetch=0,
            grid=(BH, T_pad // tq, T_pad // tk),
            in_specs=[
                pl.BlockSpec((None, tq, hd_pad),
                             lambda bh, qi, ki: (bh, qi, 0)),
                # Clamp the kv block index to the causal frontier so skipped
                # tiles are never re-fetched from HBM (TQ == TK).
                pl.BlockSpec((None, tk, hd_pad),
                             lambda bh, qi, ki: (bh, jnp.minimum(ki, qi), 0)),
                pl.BlockSpec((None, tk, hd_pad),
                             lambda bh, qi, ki: (bh, jnp.minimum(ki, qi), 0)),
            ],
            out_specs=pl.BlockSpec((None, tq, hd_pad),
                                   lambda bh, qi, ki: (bh, qi, 0)),
            scratch_shapes=[
                pltpu.VMEM((tq, 1), jnp.float32),        # running max m
                pltpu.VMEM((tq, 1), jnp.float32),        # running denom l
                pltpu.VMEM((tq, hd_pad), jnp.float32),   # running output acc
            ],
        ),
        compiler_params=pltpu.CompilerParams(
            dimension_semantics=("parallel", "parallel", "arbitrary"),
            vmem_limit_bytes=64 * 1024 * 1024),
    )(q, k, v)


# ----------------------------------------------------------------------------- full module forward
def causal_self_attention(x, w_qkv, b_qkv, w_proj, b_proj, *, n_head):
    """x: (B, T, C) f32.  Weights in JAX convention: y = x @ W + b, W: (in, out)."""
    B, T, C = x.shape
    assert C % n_head == 0
    hd = C // n_head

    # ---- fused QKV projection (Pallas tiled matmul) ----
    x2d = x.reshape(B * T, C)
    qkv = _linear(x2d, w_qkv, b_qkv)                       # (B*T, 3C) f32
    q, k, v = jnp.split(qkv, 3, axis=-1)

    # ---- wrapper-side layout plumbing: heads merged into the batch grid axis,
    #      lane-dense padded head dim, padded/aligned sequence length ----
    tq, T_pad = _tile(T, 128, 8)            # q/kv tile and padded sequence length
    hd_pad = _round_up(hd, 128)             # lane-dense head dim for the MXU

    def to_heads(t):
        t = t.reshape(B, T, n_head, hd).transpose(0, 2, 1, 3)       # (B, H, T, hd)
        t = jnp.pad(t.astype(jnp.bfloat16),
                    ((0, 0), (0, 0), (0, T_pad - T), (0, hd_pad - hd)))
        return t.reshape(B * n_head, T_pad, hd_pad)                 # (BH, T_pad, hd_pad)

    qp, kp, vp = map(to_heads, (q, k, v))

    # ---- flash attention (Pallas) ----
    y = _flash_attention(qp, kp, vp, scale=1.0 / math.sqrt(hd), t_actual=T, tq=tq)
    y = y.reshape(B, n_head, T_pad, hd_pad)[:, :, :T, :hd]          # strip padding
    y2d = y.transpose(0, 2, 1, 3).reshape(B * T, C)

    # ---- output projection (Pallas tiled matmul) ----
    out = _linear(y2d, w_proj, b_proj)                              # (B*T, C) f32
    return out.reshape(B, T, C)


# ----------------------------------------------------------------------------- reference
def reference_attention(x, w_qkv, b_qkv, w_proj, b_proj, *, n_head):
    """Plain-JAX f32 reference mirroring the PyTorch forward (dropout=0, no padding_mask)."""
    B, T, C = x.shape
    hd = C // n_head
    qkv = x @ w_qkv + b_qkv
    q, k, v = jnp.split(qkv, 3, axis=-1)
    q = q.reshape(B, T, n_head, hd).transpose(0, 2, 1, 3)
    k = k.reshape(B, T, n_head, hd).transpose(0, 2, 1, 3)
    v = v.reshape(B, T, n_head, hd).transpose(0, 2, 1, 3)
    att = (q @ jnp.swapaxes(k, -2, -1)) * (1.0 / math.sqrt(hd))
    causal = jnp.tril(jnp.ones((T, T), dtype=bool))
    att = jnp.where(causal, att, -jnp.inf)
    att = jax.nn.softmax(att, axis=-1)
    y = att @ v
    y = y.transpose(0, 2, 1, 3).reshape(B, T, C)
    return y @ w_proj + b_proj


if __name__ == "__main__":
    # config: n_embd=32, n_head=4, block_size>=T, bias=True, dropout=0.0
    B, T, C, n_head = 2, 8, 32, 4

    key = jax.random.PRNGKey(0)
    kx, k1, k2, k3, k4 = jax.random.split(key, 5)

    x = jax.random.normal(kx, (B, T, C), dtype=jnp.float32)
    w_qkv = 0.02 * jax.random.normal(k1, (C, 3 * C), dtype=jnp.float32)
    b_qkv = 0.02 * jax.random.normal(k2, (3 * C,), dtype=jnp.float32)
    w_proj = 0.02 * jax.random.normal(k3, (C, C), dtype=jnp.float32)
    b_proj = 0.02 * jax.random.normal(k4, (C,), dtype=jnp.float32)

    out = causal_self_attention(x, w_qkv, b_qkv, w_proj, b_proj, n_head=n_head)
    out = jax.block_until_ready(out)

    ref = reference_attention(x, w_qkv, b_qkv, w_proj, b_proj, n_head=n_head)
    assert out.shape == (B, T, C)
    max_err = float(jnp.max(jnp.abs(out - ref)))
    # bf16 MXU operands + approx reciprocal -> loosened tolerance vs f32 reference
    assert jnp.allclose(out, ref, atol=2e-2, rtol=2e-2), f"mismatch vs reference (max abs err {max_err})"

    print("KERNEL_OK")
</pallas_src>

<mosaic_0001>
module attributes {stable_mosaic.version = 11 : i64} {
  func.func @_linear_kernel(%arg0: i32, %arg1: i32, %arg2: i32, %arg3: memref<16x128xbf16, #tpu.memory_space<vmem>>, %arg4: memref<128x128xbf16, #tpu.memory_space<vmem>>, %arg5: memref<1x128xf32, #tpu.memory_space<vmem>>, %arg6: memref<16x128xf32, #tpu.memory_space<vmem>>, %arg7: memref<16x128xf32, #tpu.memory_space<vmem>>) attributes {dimension_semantics = [#tpu.dimension_semantics<parallel>, #tpu.dimension_semantics<parallel>, #tpu.dimension_semantics<arbitrary>], iteration_bounds = array<i64: 1, 1, 1>, scalar_prefetch = 0 : i64, scratch_operands = 1 : i64, tpu.core_type = #tpu.core_type<tc>, window_params = [{transform_indices = @transform_0, window_bounds = array<i64: 16, 128>}, {transform_indices = @transform_1, window_bounds = array<i64: 128, 128>}, {transform_indices = @transform_2, window_bounds = array<i64: 1, 128>}, {transform_indices = @transform_3, window_bounds = array<i64: 16, 128>}]} {
    %c0_i32 = arith.constant 0 : i32
    %0 = arith.cmpi eq, %arg2, %c0_i32 : i32
    %1 = arith.extui %0 : i1 to i32
    %c0_i32_0 = arith.constant 0 : i32
    %2 = arith.cmpi ne, %1, %c0_i32_0 : i32
    scf.if %2 {
      %cst_10 = arith.constant 0.000000e+00 : f32
      %12 = vector.broadcast %cst_10 : f32 to vector<16x128xf32>
      %c0_11 = arith.constant 0 : index
      %c0_12 = arith.constant 0 : index
      %13 = vector.load %arg7[%c0_11, %c0_12] : memref<16x128xf32, #tpu.memory_space<vmem>>, vector<16x128xf32>
      tpu.vector_store %arg7[%c0_11, %c0_12], %12 {strides = array<i32>} : memref<16x128xf32, #tpu.memory_space<vmem>>, vector<16x128xf32>,
    } else {
    }
    %c0 = arith.constant 0 : index
    %c0_1 = arith.constant 0 : index
    %3 = vector.load %arg7[%c0, %c0_1] : memref<16x128xf32, #tpu.memory_space<vmem>>, vector<16x128xf32>
    %c0_2 = arith.constant 0 : index
    %c0_3 = arith.constant 0 : index
    %4 = vector.load %arg3[%c0_2, %c0_3] : memref<16x128xbf16, #tpu.memory_space<vmem>>, vector<16x128xbf16>
    %c0_4 = arith.constant 0 : index
    %c0_5 = arith.constant 0 : index
    %5 = vector.load %arg4[%c0_4, %c0_5] : memref<128x128xbf16, #tpu.memory_space<vmem>>, vector<128x128xbf16>
    %cst = arith.constant dense<0.000000e+00> : vector<16x128xf32>
    %6 = tpu.matmul %4, %5, %cst {dimension_numbers = #tpu.dot_dimension_numbers<[1], [0], [0], [1], [0, 0, 1, 1], [], []>} : vector<16x128xbf16>, vector<128x128xbf16>, vector<16x128xf32> -> vector<16x128xf32>
    %7 = arith.addf %3, %6 : vector<16x128xf32>
    %c0_6 = arith.constant 0 : index
    %c0_7 = arith.constant 0 : index
    %8 = vector.load %arg7[%c0_6, %c0_7] : memref<16x128xf32, #tpu.memory_space<vmem>>, vector<16x128xf32>
    tpu.vector_store %arg7[%c0_6, %c0_7], %7 {strides = array<i32>} : memref<16x128xf32, #tpu.memory_space<vmem>>, vector<16x128xf32>,
    %c0_i32_8 = arith.constant 0 : i32
    %9 = arith.cmpi eq, %arg2, %c0_i32_8 : i32
    %10 = arith.extui %9 : i1 to i32
    %c0_i32_9 = arith.constant 0 : i32
    %11 = arith.cmpi ne, %10, %c0_i32_9 : i32
    scf.if %11 {
      %c0_10 = arith.constant 0 : index
      %c0_11 = arith.constant 0 : index
      %12 = vector.load %arg7[%c0_10, %c0_11] : memref<16x128xf32, #tpu.memory_space<vmem>>, vector<16x128xf32>
      %c0_12 = arith.constant 0 : index
      %c0_13 = arith.constant 0 : index
      %13 = vector.load %arg5[%c0_12, %c0_13] : memref<1x128xf32, #tpu.memory_space<vmem>>, vector<1x128xf32>
      %14 = vector.broadcast %13 : vector<1x128xf32> to vector<16x128xf32>
      %15 = arith.addf %12, %14 : vector<16x128xf32>
      %c0_14 = arith.constant 0 : index
      %c0_15 = arith.constant 0 : index
      %16 = vector.load %arg6[%c0_14, %c0_15] : memref<16x128xf32, #tpu.memory_space<vmem>>, vector<16x128xf32>
      tpu.vector_store %arg6[%c0_14, %c0_15], %15 {strides = array<i32>} : memref<16x128xf32, #tpu.memory_space<vmem>>, vector<16x128xf32>,
    } else {
    }
    return
  }
  func.func @transform_0(%arg0: i32, %arg1: i32, %arg2: i32) -> (i32, i32) {
    %c0_i32 = arith.constant 0 : i32
    return %arg0, %arg2 : i32, i32
  }
  func.func @transform_1(%arg0: i32, %arg1: i32, %arg2: i32) -> (i32, i32) {
    %c0_i32 = arith.constant 0 : i32
    return %arg2, %arg1 : i32, i32
  }
  func.func @transform_2(%arg0: i32, %arg1: i32, %arg2: i32) -> (i32, i32) {
    %c0_i32 = arith.constant 0 : i32
    %c0_i32_0 = arith.constant 0 : i32
    return %c0_i32, %arg1 : i32, i32
  }
  func.func @transform_3(%arg0: i32, %arg1: i32, %arg2: i32) -> (i32, i32) {
    %c0_i32 = arith.constant 0 : i32
    return %arg0, %arg1 : i32, i32
  }
}

</mosaic_0001>

<bundles_post_ra>
// kernel: tpu_custom_call.1
= control target key start
LH: loop header
LB: loop body
LE: loop exit
PB: predicated region body
PF: predicated region fallthrough
CT: control target
= control target key end

     0   :  { %8 = vsyncpa [#allocation4], 0  ;;  %s348_s0 = inlined_call_operand.hbm [shape: bf16[16,128], index: 0, kind: input, shape index: {}]   ;;  %s349_s1 = inlined_call_operand.hbm [shape: bf16[128,128], index: 1, kind: input, shape index: {}]   ;;  %s350_s2 = inlined_call_operand.vmem [shape: f32[1,128], index: 2, kind: input, shape index: {}]   ;;  %s351_s3 = inlined_call_operand.hbm [shape: f32[16,128], index: 3, kind: output, shape index: {}]  }
   0x1   :  { %9 = vsyncpa [#allocation7], 0 }
   0x2   :  { %10 = vsyncpa [#allocation5], 0  ;;  %s15_s14 = sshll.u32 %s348_s0, 4  ;;  %s309_s15 = smov [#allocation3]   ;;  %s16_s14 = int_to_ptr.hbm [resolvable:$true] %s15_s14 }
   0x3   :  { %s17_s16 = sshll.u32 %s309_s15, 4  ;;  %s28_s19 = sshll.u32 %s349_s1, 4  ;;  %s18_s16 = int_to_ptr.vmem [resolvable:$true] %s17_s16  ;;  %s29_s19 = int_to_ptr.hbm [resolvable:$true] %s28_s19 }
   0x4   :  { %s310_s20 = smov 64   ;;  %s311_s21 = smov 4  }
   0x5   :  { %23 = dma.hbm_to_vmem [thread:$0]  %s16_s14, 128, %s18_s16, [#allocation4], %s310_s20, %s310_s20, %s311_s21  }
   0x6   :  { %s312_s22 = smov [#allocation6]  }
   0x7   :  { %s30_s23 = sshll.u32 %s312_s22, 4  ;;  %s31_s23 = int_to_ptr.vmem [resolvable:$true] %s30_s23 }
   0x8   :  { %36 = dma.hbm_to_vmem [thread:$0]  %s29_s19, 1024, %s31_s23, [#allocation7], %s310_s20, %s310_s20, %s311_s21  }
   0x9   :  { %303 = dma.done.wait [#allocation4], 128  }
   0xa   :  { %304 = vsyncadd [#allocation4], 4294967168 }
   0xb   :  { %305 = dma.done.wait [#allocation7], 1024  }
   0xc   :  { %306 = vsyncadd [#allocation7], 4294966272  ;;  %v222_v0 = vld [vmem:[#allocation6 + $0x38] sm:$0xff]  ;;  %v221_v1 = vld [vmem:[#allocation6 + $0x30] sm:$0xff]  ;;  %s313_s24 = smov [#allocation8]   ;;  %s164_s28 = sshll.u32 %s351_s3, 4  ;;  %s165_s28 = int_to_ptr.hbm [resolvable:$true] %s164_s28 }
   0xd   :  { %127 = vmatpush.bf16.msra.mxu0 %v222_v0  ;;  %v220_v2 = vld [vmem:[#allocation6 + $0x28] sm:$0xff]  ;;  %v219_v3 = vld [vmem:[#allocation6 + $0x20] sm:$0xff]  ;;  %v218_v4 = vld [vmem:[#allocation6 + $0x18] sm:$0xff]  ;;  %s162_s25 = sshll.u32 %s313_s24, 4  ;;  %s314_s29 = smov 128   ;;  %s163_s25 = int_to_ptr.vmem [resolvable:$true] %s162_s25 }
   0xe   :  { %v217_v5 = vld [vmem:[#allocation6 + $0x10] sm:$0xff]  ;;  %v216_v6 = vld [vmem:[#allocation6 + $0x8] sm:$0xff]  ;;  %v215_v7 = vld [vmem:[#allocation6] sm:$0xff]  ;;  %s315_s30 = smov 8  }
   0xf   :  { %v214_v8 = vld [vmem:[#allocation3] sm:$0xff] }
  0x10   :  { %v230_v9 = vld [vmem:[%s350_s2] ss:$0 sm:$0xff] }
  0x11   :  { %128 = vmatpush.bf16.msra.mxu0 %v221_v1 }
  0x15   :  { %129 = vmatpush.bf16.msra.mxu0 %v220_v2 }
  0x19   :  { %130 = vmatpush.bf16.msra.mxu0 %v219_v3 }
  0x1d   :  { %131 = vmatpush.bf16.msra.mxu0 %v218_v4 }
  0x21   :  { %132 = vmatpush.bf16.msra.mxu0 %v217_v5 }
  0x25   :  { %133 = vmatpush.bf16.msra.mxu0 %v216_v6 }
  0x29   :  { %134 = vmatpush.bf16.msra.mxu0 %v215_v7 }
  0x2c   :  { %135 = vmatmul.bf16.vlgmr.msra.gmra.mxu0 %v214_v8 }
  0xa9   :  { %v136_v10 = vpop.f32.mrf.mxu0 }
  0xaa   :  { %v154_v11 = vadd.f32 %v230_v9, %v136_v10 }
  0xac   :  { %156 = vst [vmem:[#allocation8] sm:$0xff] %v154_v11 }
  0xb1   :  { %v138_v12 = vpop.f32.mrf.mxu0 }
  0xb2   :  { %v155_v13 = vadd.f32 %v230_v9, %v138_v12 }
  0xb4   :  { %157 = vst [vmem:[#allocation8 + $0x8] sm:$0xff] %v155_v13 }
  0xb5   :  { %170 = dma.vmem_to_hbm [thread:$0]  %s163_s25, 256, %s165_s28, [#allocation5], %s314_s29, %s314_s29, %s315_s30  }
  0xb6   :  { %307 = dma.done.wait [#allocation5], 256  }
  0xb7   :  { %308 = vsyncadd [#allocation5], 4294967040 }
  0xb8   :  { %175 = vsyncpa [#allocation4], 1 }
  0xb9   :  { %176 = vsyncpa [#allocation7], 1 }
  0xba   :  { %177 = vsyncpa [#allocation5], 1 }

</bundles_post_ra>
